<compile_context>
chip_gen: v5e
topology: v5e:2x2
jax: 0.10.0
libtpu: 0.0.40
codegen_flags: <defaults>
</compile_context>

<pallas_src>
import jax
import jax.numpy as jnp
from jax.experimental import pallas as pl
from jax.experimental.pallas import tpu as pltpu


def _round_up(n, m):
    return ((n + m - 1) // m) * m


def _sigmoid_f32(z):
    # Single EUP op (tanh) instead of exp + reciprocal; exact sigmoid identity.
    return 0.5 * jnp.tanh(0.5 * z) + 0.5


def _gamenet_kernel(x_ref, w1_ref, b1_ref, w2_ref, b2_ref, o_ref):
    # fc1: [tb, f_in] @ [f_in, hidden]  (bf16 MXU operands, f32 accumulation)
    x_bf = x_ref[...].astype(jnp.bfloat16)
    h = jnp.dot(x_bf, w1_ref[...], preferred_element_type=jnp.float32)
    h = _sigmoid_f32(h + b1_ref[...])                  # f32 activation math

    # fc2: [tb, hidden] @ [hidden, outputs]  (narrow N; kernel is DMA-bound,
    # MXU shape is irrelevant)
    y = jnp.dot(h.astype(jnp.bfloat16), w2_ref[...],
                preferred_element_type=jnp.float32)
    y = _sigmoid_f32(y + b2_ref[...])

    o_ref[...] = y.astype(o_ref.dtype)                 # narrow (tb, outputs) store


def gamenet_forward(x, w1, b1, w2, b2, *, tile_b=8192, out_dtype=None):
    """x: [B, inputs]; w1: [inputs, hidden]; b1: [hidden];
    w2: [hidden, outputs]; b2: [outputs].  Returns [B, outputs]."""
    B, f_in = x.shape
    hidden = w1.shape[1]
    outputs = w2.shape[1]
    out_dtype = x.dtype if out_dtype is None else out_dtype

    # bf16 MXU operand storage for the (tiny) weights; biases stay f32.
    w1_bf = w1.astype(jnp.bfloat16)
    w2_bf = w2.astype(jnp.bfloat16)
    b1_2d = b1.reshape(1, -1).astype(jnp.float32)
    b2_2d = b2.reshape(1, -1).astype(jnp.float32)

    # Batch tile: multiple of 8 sublanes, capped by tile_b and by the batch.
    tb = _round_up(min(tile_b, B), 8)
    # v7x: once the batch is big enough, guarantee >= 2 grid blocks so the
    # "parallel" batch axis uses both TensorCores (harmless on v5e/v6e).
    if B >= 16:
        tb = min(tb, _round_up(pl.cdiv(B, 2), 8))
    tb = max(tb, 8)
    grid = (pl.cdiv(B, tb),)

    flops = 2 * B * (f_in * hidden + hidden * outputs)
    transcendentals = B * (hidden + outputs)           # one tanh per activation
    bytes_accessed = int(
        B * f_in * x.dtype.itemsize                    # x in
        + w1_bf.size * 2 + w2_bf.size * 2              # bf16 weights
        + b1_2d.size * 4 + b2_2d.size * 4              # f32 biases
        + B * outputs * jnp.dtype(out_dtype).itemsize  # un-padded output
    )

    out = pl.pallas_call(
        _gamenet_kernel,
        out_shape=jax.ShapeDtypeStruct((B, outputs), out_dtype),
        grid=grid,
        in_specs=[
            pl.BlockSpec((tb, f_in), lambda i: (i, 0)),         # x: batch-tiled
            pl.BlockSpec((f_in, hidden), lambda i: (0, 0)),     # w1: VMEM-resident
            pl.BlockSpec((1, hidden), lambda i: (0, 0)),        # b1: VMEM-resident
            pl.BlockSpec((hidden, outputs), lambda i: (0, 0)),  # w2: VMEM-resident
            pl.BlockSpec((1, outputs), lambda i: (0, 0)),       # b2: VMEM-resident
        ],
        out_specs=pl.BlockSpec((tb, outputs), lambda i: (i, 0)),
        compiler_params=pltpu.CompilerParams(
            dimension_semantics=("parallel",),      # shard batch across TCs (v7x)
            vmem_limit_bytes=32 * 1024 * 1024,      # explicit; v7x-safe headroom
        ),
        cost_estimate=pl.CostEstimate(
            flops=flops,
            transcendentals=transcendentals,
            bytes_accessed=bytes_accessed,
        ),
    )(x, w1_bf, b1_2d, w2_bf, b2_2d)

    return out


def init_gamenet_params(key, inputs=11, outputs=4, dtype=jnp.float32):
    """Mirrors torch.nn.Linear default init U(-1/sqrt(fan_in), 1/sqrt(fan_in)).
    Weights stored pre-transposed as [in, out]."""
    hidden = inputs + 3
    k1, k2, k3, k4 = jax.random.split(key, 4)
    bound1 = 1.0 / jnp.sqrt(jnp.array(inputs, dtype))
    bound2 = 1.0 / jnp.sqrt(jnp.array(hidden, dtype))
    w1 = jax.random.uniform(k1, (inputs, hidden), dtype, -bound1, bound1)
    b1 = jax.random.uniform(k2, (hidden,), dtype, -bound1, bound1)
    w2 = jax.random.uniform(k3, (hidden, outputs), dtype, -bound2, bound2)
    b2 = jax.random.uniform(k4, (outputs,), dtype, -bound2, bound2)
    return w1, b1, w2, b2


# TODO(synk): mutate/crossover/save_model/load_model are GA / serialization helpers,
# not part of the forward pass; no Pallas equivalent implemented.

if __name__ == "__main__":
    key = jax.random.PRNGKey(0)
    k_x, k_x2, k_p = jax.random.split(key, 3)

    inputs, outputs = 11, 4
    w1, b1, w2, b2 = init_gamenet_params(k_p, inputs, outputs)

    def ref_fn(xx):
        return jax.nn.sigmoid(jax.nn.sigmoid(xx @ w1 + b1) @ w2 + b2)

    # Small batch: single grid block.
    batch = 8
    x = jax.random.normal(k_x, (batch, inputs), jnp.float32)
    out = jax.block_until_ready(gamenet_forward(x, w1, b1, w2, b2))
    ref = ref_fn(x)
    assert out.shape == (batch, outputs)
    assert jnp.allclose(out, ref, atol=2e-2, rtol=2e-2), (
        f"max abs err {jnp.max(jnp.abs(out - ref))}")

    # Slightly larger batch: exercises the >=2-block (dual-TC on v7x) tiling path.
    batch2 = 64
    x2 = jax.random.normal(k_x2, (batch2, inputs), jnp.float32)
    out2 = jax.block_until_ready(gamenet_forward(x2, w1, b1, w2, b2))
    ref2 = ref_fn(x2)
    assert out2.shape == (batch2, outputs)
    assert jnp.allclose(out2, ref2, atol=2e-2, rtol=2e-2), (
        f"max abs err {jnp.max(jnp.abs(out2 - ref2))}")

    print("KERNEL_OK")
</pallas_src>

<mosaic_0001>
module attributes {stable_mosaic.version = 11 : i64} {
  func.func @_gamenet_kernel(%arg0: i32, %arg1: memref<8x11xf32, #tpu.memory_space<vmem>>, %arg2: memref<11x14xbf16, #tpu.memory_space<vmem>>, %arg3: memref<1x14xf32, #tpu.memory_space<vmem>>, %arg4: memref<14x4xbf16, #tpu.memory_space<vmem>>, %arg5: memref<1x4xf32, #tpu.memory_space<vmem>>, %arg6: memref<8x4xf32, #tpu.memory_space<vmem>>) attributes {dimension_semantics = [#tpu.dimension_semantics<parallel>], iteration_bounds = array<i64: 1>, scalar_prefetch = 0 : i64, scratch_operands = 0 : i64, tpu.core_type = #tpu.core_type<tc>, window_params = [{transform_indices = @transform_0, window_bounds = array<i64: 8, 11>}, {pipeline_mode = #tpu.pipeline_mode<synchronous>, transform_indices = @transform_1, window_bounds = array<i64: 11, 14>}, {pipeline_mode = #tpu.pipeline_mode<synchronous>, transform_indices = @transform_2, window_bounds = array<i64: 1, 14>}, {pipeline_mode = #tpu.pipeline_mode<synchronous>, transform_indices = @transform_3, window_bounds = array<i64: 14, 4>}, {pipeline_mode = #tpu.pipeline_mode<synchronous>, transform_indices = @transform_4, window_bounds = array<i64: 1, 4>}, {transform_indices = @transform_5, window_bounds = array<i64: 8, 4>}]} {
    %c0 = arith.constant 0 : index
    %c0_0 = arith.constant 0 : index
    %0 = vector.load %arg1[%c0, %c0_0] : memref<8x11xf32, #tpu.memory_space<vmem>>, vector<8x11xf32>
    %1 = arith.truncf %0 : vector<8x11xf32> to vector<8x11xbf16>
    %c0_1 = arith.constant 0 : index
    %c0_2 = arith.constant 0 : index
    %2 = vector.load %arg2[%c0_1, %c0_2] : memref<11x14xbf16, #tpu.memory_space<vmem>>, vector<11x14xbf16>
    %cst = arith.constant dense<0.000000e+00> : vector<8x14xf32>
    %3 = tpu.matmul %1, %2, %cst {dimension_numbers = #tpu.dot_dimension_numbers<[1], [0], [0], [1], [0, 0, 1, 1], [], []>} : vector<8x11xbf16>, vector<11x14xbf16>, vector<8x14xf32> -> vector<8x14xf32>
    %c0_3 = arith.constant 0 : index
    %c0_4 = arith.constant 0 : index
    %4 = vector.load %arg3[%c0_3, %c0_4] : memref<1x14xf32, #tpu.memory_space<vmem>>, vector<1x14xf32>
    %5 = vector.broadcast %4 : vector<1x14xf32> to vector<8x14xf32>
    %6 = arith.addf %3, %5 : vector<8x14xf32>
    %cst_5 = arith.constant 5.000000e-01 : f32
    %7 = vector.broadcast %cst_5 : f32 to vector<8x14xf32>
    %8 = arith.mulf %7, %6 : vector<8x14xf32>
    %9 = math.tanh %8 : vector<8x14xf32>
    %cst_6 = arith.constant 5.000000e-01 : f32
    %10 = vector.broadcast %cst_6 : f32 to vector<8x14xf32>
    %11 = arith.mulf %10, %9 : vector<8x14xf32>
    %cst_7 = arith.constant 5.000000e-01 : f32
    %12 = vector.broadcast %cst_7 : f32 to vector<8x14xf32>
    %13 = arith.addf %11, %12 : vector<8x14xf32>
    %14 = arith.truncf %13 : vector<8x14xf32> to vector<8x14xbf16>
    %c0_8 = arith.constant 0 : index
    %c0_9 = arith.constant 0 : index
    %15 = vector.load %arg4[%c0_8, %c0_9] : memref<14x4xbf16, #tpu.memory_space<vmem>>, vector<14x4xbf16>
    %cst_10 = arith.constant dense<0.000000e+00> : vector<8x4xf32>
    %16 = tpu.matmul %14, %15, %cst_10 {dimension_numbers = #tpu.dot_dimension_numbers<[1], [0], [0], [1], [0, 0, 1, 1], [], []>} : vector<8x14xbf16>, vector<14x4xbf16>, vector<8x4xf32> -> vector<8x4xf32>
    %c0_11 = arith.constant 0 : index
    %c0_12 = arith.constant 0 : index
    %17 = vector.load %arg5[%c0_11, %c0_12] : memref<1x4xf32, #tpu.memory_space<vmem>>, vector<1x4xf32>
    %18 = vector.broadcast %17 : vector<1x4xf32> to vector<8x4xf32>
    %19 = arith.addf %16, %18 : vector<8x4xf32>
    %cst_13 = arith.constant 5.000000e-01 : f32
    %20 = vector.broadcast %cst_13 : f32 to vector<8x4xf32>
    %21 = arith.mulf %20, %19 : vector<8x4xf32>
    %22 = math.tanh %21 : vector<8x4xf32>
    %cst_14 = arith.constant 5.000000e-01 : f32
    %23 = vector.broadcast %cst_14 : f32 to vector<8x4xf32>
    %24 = arith.mulf %23, %22 : vector<8x4xf32>
    %cst_15 = arith.constant 5.000000e-01 : f32
    %25 = vector.broadcast %cst_15 : f32 to vector<8x4xf32>
    %26 = arith.addf %24, %25 : vector<8x4xf32>
    %c0_16 = arith.constant 0 : index
    %c0_17 = arith.constant 0 : index
    %27 = vector.load %arg6[%c0_16, %c0_17] : memref<8x4xf32, #tpu.memory_space<vmem>>, vector<8x4xf32>
    tpu.vector_store %arg6[%c0_16, %c0_17], %26 {strides = array<i32>} : memref<8x4xf32, #tpu.memory_space<vmem>>, vector<8x4xf32>,
    return
  }
  func.func @transform_0(%arg0: i32) -> (i32, i32) {
    %c0_i32 = arith.constant 0 : i32
    %c0_i32_0 = arith.constant 0 : i32
    return %arg0, %c0_i32 : i32, i32
  }
  func.func @transform_1(%arg0: i32) -> (i32, i32) {
    %c0_i32 = arith.constant 0 : i32
    %c0_i32_0 = arith.constant 0 : i32
    %c0_i32_1 = arith.constant 0 : i32
    return %c0_i32, %c0_i32_0 : i32, i32
  }
  func.func @transform_2(%arg0: i32) -> (i32, i32) {
    %c0_i32 = arith.constant 0 : i32
    %c0_i32_0 = arith.constant 0 : i32
    %c0_i32_1 = arith.constant 0 : i32
    return %c0_i32, %c0_i32_0 : i32, i32
  }
  func.func @transform_3(%arg0: i32) -> (i32, i32) {
    %c0_i32 = arith.constant 0 : i32
    %c0_i32_0 = arith.constant 0 : i32
    %c0_i32_1 = arith.constant 0 : i32
    return %c0_i32, %c0_i32_0 : i32, i32
  }
  func.func @transform_4(%arg0: i32) -> (i32, i32) {
    %c0_i32 = arith.constant 0 : i32
    %c0_i32_0 = arith.constant 0 : i32
    %c0_i32_1 = arith.constant 0 : i32
    return %c0_i32, %c0_i32_0 : i32, i32
  }
  func.func @transform_5(%arg0: i32) -> (i32, i32) {
    %c0_i32 = arith.constant 0 : i32
    %c0_i32_0 = arith.constant 0 : i32
    return %arg0, %c0_i32 : i32, i32
  }
}

</mosaic_0001>

<bundles_post_ra>
// kernel: tpu_custom_call.1
= control target key start
LH: loop header
LB: loop body
LE: loop exit
PB: predicated region body
PF: predicated region fallthrough
CT: control target
= control target key end

     0   :  { %10 = vsyncpa [#allocation3], 0  ;;  %s170_s21 = smov [#allocation2]   ;;  %s171_s23 = smov 64   ;;  %s225_s0 = inlined_call_operand.vmem [shape: f32[8,11], index: 0, kind: input, shape index: {}]   ;;  %s226_s1 = inlined_call_operand.hbm [shape: bf16[11,14], index: 1, kind: input, shape index: {}]   ;;  %s227_s2 = inlined_call_operand.vmem [shape: f32[1,14], index: 2, kind: input, shape index: {}]   ;;  %s228_s3 = inlined_call_operand.vmem [shape: bf16[14,4], index: 3, kind: input, shape index: {}]   ;;  %s229_s4 = inlined_call_operand.vmem [shape: f32[1,4], index: 4, kind: input, shape index: {}]   ;;  %s230_s5 = inlined_call_operand.vmem [shape: f32[8,4], index: 5, kind: output, shape index: {}]  }
   0x1   :  { %s17_s20 = sshll.u32 %s226_s1, 4  ;;  %s19_s22 = sshll.u32 %s170_s21, 4  ;;  %s18_s20 = int_to_ptr.hbm [resolvable:$true] %s17_s20  ;;  %s20_s22 = int_to_ptr.vmem [resolvable:$true] %s19_s22 }
   0x2   :  { %s172_s24 = smov 4  }
   0x3   :  { %25 = dma.hbm_to_vmem [thread:$0]  %s18_s20, 128, %s20_s22, [#allocation3], %s171_s23, %s171_s23, %s172_s24  }
   0x4   :  { %168 = dma.done.wait [#allocation3], 128  }
   0x5   :  { %169 = vsyncadd [#allocation3], 4294967168  ;;  %vm54_vm0 = vcmask 1044480   ;;  %vm55_vm1 = vcmask 1045504   ;;  %v173_v0 = vmov 65535   ;;  %v37_v6 = vld [vmem:[%s225_s0] sm:$0xff] }
   0x6   :  { %v56_v1 = vsel %vm54_vm0, 4294967295, %v173_v0  ;;  %v124_v2 = vld [vmem:[#allocation2] sm:$0xf]  ;;  %v132_v3 = vld [vmem:[#allocation2] sm:$0x30]  ;;  %v38_v8 = vpack.c.bf16 %v37_v6, %v37_v6  ;;  %vm50_vm2 = vcmask 89088  }
   0x7   :  { %v57_v4 = vsel %vm55_vm1, %v56_v1, 0  ;;  %v125_v5 = vor.u32 %v132_v3, %v124_v2  ;;  %v129_v9 = vld [vmem:[%s228_s3] sm:$0xf]  ;;  %v133_v10 = vld [vmem:[%s228_s3] sm:$0x70]  ;;  %vm94_vm3 = vcmask 1046528  }
   0x8   :  { %v130_v11 = vor.u32 %v133_v10, %v129_v9  ;;  %v138_v13 = vld [vmem:[%s227_s2] ss:$0 sm:$0xff]  ;;  %vm90_vm4 = vcmask 113664   ;;  %vm115_vm5 = vcmask 31744  }
   0x9   :  { %v59_v7 = vand.u32 %v125_v5, %v57_v4  ;;  %v139_v22 = vld [vmem:[%s229_s4] ss:$0 sm:$0xff] }
   0xa   :  { %v96_v12 = vsel %vm94_vm3, %v130_v11, 0 }
   0xb   :  { %68 = vmatpush.bf16.msra.mxu0 %v59_v7  ;;  %105 = vmatpush.bf16.msra.mxu1 %v96_v12 }
   0xe   :  { %126 = vmatmul.msk.bf16.vlgmr.msra.gmra.mxu0 %vm50_vm2, %v38_v8 }
  0x8b   :  { %v70_v14 = vpop.f32.mrf.mxu0 }
  0x8c   :  { %v71_v15 = vadd.f32 %v138_v13, %v70_v14 }
  0x8e   :  { %v74_v16 = vmul.f32 0.5, %v71_v15 }
  0x90   :  { %140 = vtanh.f32 %v74_v16 }
  0x93   :  { %v72_v17 = vpop.f32.mrf.mxu0 }
  0x96   :  { %v141_v18 = vpop.eup %140 }
  0x97   :  { %v76_v19 = vmul.f32 0.5, %v141_v18 }
  0x99   :  { %v77_v20 = vadd.f32 0.5, %v76_v19 }
  0x9b   :  { %v78_v21 = vpack.c.bf16 %v77_v20, %v77_v20 }
  0x9d   :  { %131 = vmatmul.msk.bf16.vlgmr.msra.gmra.mxu1 %vm90_vm4, %v78_v21 }
 0x11a   :  { %v107_v23 = vpop.f32.mrf.mxu1 }
 0x11b   :  { %v108_v24 = vadd.f32 %v139_v22, %v107_v23 }
 0x11d   :  { %v111_v25 = vmul.f32 0.5, %v108_v24 }
 0x11f   :  { %142 = vtanh.f32 %v111_v25 }
 0x122   :  { %v109_v26 = vpop.f32.mrf.mxu1 }
 0x125   :  { %v143_v27 = vpop.eup %142 }
 0x126   :  { %v113_v28 = vmul.f32 0.5, %v143_v27 }
 0x128   :  { %v114_v29 = vadd.f32 0.5, %v113_v28 }
 0x12a   :  { %116 = vst.msk [vmem:[%s230_s5] sm:$0xff] %vm115_vm5, %v114_v29 }
 0x12b   :  { %121 = vsyncpa [#allocation3], 1 }

</bundles_post_ra>
